<compile_context>
chip_gen: v7x
topology: tpu7x:2x2x1
jax: 0.10.0
libtpu: 0.0.40
codegen_flags: <defaults>
</compile_context>

<pallas_src>
import functools

import jax
import jax.numpy as jnp
from jax import lax
from jax.experimental import pallas as pl
from jax.experimental.pallas import tpu as pltpu


# ----------------------------- Pallas kernel --------------------------------

def _lane_roll(x, shift):
    """y[..., i] = x[..., (i + shift) mod L] for a static shift (lane rotate)."""
    L = x.shape[-1]
    shift = shift % L
    if shift == 0:
        return x
    return jnp.concatenate([x[..., shift:], x[..., :shift]], axis=-1)


def _convnet_kernel(*refs, layer_meta, batch_tile):
    """Fused ConvNet forward for one batch tile.

    Activation layout inside the kernel: [channels, batch_tile * time]
    (batch-major, time-minor on the lane axis).

    refs = (x_ref, [w_ref, b_ref, a_ref, c_ref] per layer ..., o_ref)
      x_ref: [C0, batch_tile*N0]
      w_ref: [W, Cout, Cin]               conv weight, tap-major
      b_ref: [Cout, 1]                    conv bias
      a_ref: [Cout, batch_tile*N_out]     Saxpy scale (pre-tiled over batch)
      c_ref: [Cout, batch_tile*N_out]     Saxpy shift
      o_ref: [C_last, batch_tile*N_last]
    """
    x_ref = refs[0]
    o_ref = refs[-1]
    param_refs = refs[1:-1]

    cur = x_ref[...].astype(jnp.float32)                       # [C0, bt*N0]
    for li, (cin, cout, width, pool, n_in) in enumerate(layer_meta):
        w_ref, b_ref, a_ref, c_ref = param_refs[4 * li:4 * (li + 1)]
        lp = (width - 1) // 2
        L = batch_tile * n_in

        # Per-sample time index (shared by all taps of this layer).
        t_mod = lax.broadcasted_iota(jnp.int32, (1, L), 1) % n_in

        # --- Conv1d(padding='same', padding_mode='circular', stride=1) ---
        # Per tap k: per-sample circular shift of the whole batch tile via two
        # global lane rolls + a mask select, then one MXU matmul with that
        # tap's [Cout, Cin] weights.
        acc = None
        for k in range(width):
            s = (k - lp) % n_in
            if s == 0:
                xk = cur
            else:
                main = _lane_roll(cur, s)            # right for t <  n_in - s
                corr = _lane_roll(cur, s - n_in)     # right for t >= n_in - s
                xk = jnp.where(t_mod < n_in - s, main, corr)
            yk = jnp.dot(w_ref[k], xk, preferred_element_type=jnp.float32)
            acc = yk if acc is None else acc + yk
        # Dropout(p=0.0) is the identity; activation = tanh (EUP slot).
        y = jnp.tanh(acc + b_ref[...])                          # [Cout, L]

        # --- MaxPool1d(kernel=stride=pool) ---
        if pool > 1:
            n_out = n_in // pool
            L_out = batch_tile * n_out
            m = y
            for r in range(1, pool):
                # Plain global roll is safe: selected output columns are
                # t = j*pool with j <= n_in/pool - 1, so t + r never crosses
                # a sample boundary.
                m = jnp.maximum(m, _lane_roll(y, r))
            # Compaction: output global column g' takes source column pool*g'.
            # 0/1 selection matmul keeps the downsample on the MXU.
            # TODO(synk): for very large batch_tile*N switch to a strided
            # lane-gather compaction instead of an O(L*L_out) selection matmul.
            row = lax.broadcasted_iota(jnp.int32, (L, L_out), 0)
            col = lax.broadcasted_iota(jnp.int32, (L, L_out), 1)
            sel = (row == col * pool).astype(jnp.float32)
            y = jnp.dot(m, sel, preferred_element_type=jnp.float32)  # [Cout, L_out]

        # --- Saxpy norm: per-(channel, time) affine, pre-tiled over batch ---
        cur = a_ref[...] * y + c_ref[...]

    o_ref[...] = cur.astype(o_ref.dtype)


# ------------------------------ wrapper --------------------------------------

def convnet_forward(x, params, pool_sizes, *, batch_tile=None,
                    vmem_limit_bytes=32 * 1024 * 1024):
    """ConvNet.forward: input [B, C0, N0] or [B, N0]; output [B, C_last, N_last]."""
    if x.ndim == 2:
        x = x.reshape(x.shape[0], 1, -1)
    B, C0, N0 = x.shape

    # One batch tile == whole batch by default (single grid step at demo size).
    if batch_tile is None:
        batch_tile = B
    assert B % batch_tile == 0

    # Static per-layer metadata + params in kernel-friendly layouts (tiny,
    # one-time reshapes; constant-folded under jit).
    layer_meta = []
    flat_params = []
    cin, n_in = C0, N0
    for (w, b, a, c), pool in zip(params, pool_sizes):
        cout, cin_w, width = w.shape
        assert cin_w == cin
        assert pool >= 1 and n_in % pool == 0
        # TODO(synk): nn.Upsample(linear) branch (n0 // n1 < 1), stride != 1,
        # AvgPool and BatchNorm options are not implemented (demo config is
        # max-pool + Saxpy + stride 1).
        layer_meta.append((cin, cout, width, pool, n_in))
        n_out = n_in // pool
        w_taps = jnp.transpose(w, (2, 0, 1))                # [W, Cout, Cin]
        a_t = jnp.tile(a, (1, batch_tile))                  # [Cout, bt*n_out]
        c_t = jnp.tile(c, (1, batch_tile))
        flat_params += [w_taps, b.reshape(cout, 1), a_t, c_t]
        cin, n_in = cout, n_out
    c_last, n_last = cin, n_in

    if batch_tile != B:
        # Non-full blocks must be lane-aligned for the (8, 128) constraint.
        assert (batch_tile * N0) % 128 == 0 and (batch_tile * n_last) % 128 == 0

    # Lane-flattened input slab [C0, B*N0] (batch-major, time-minor on lanes).
    x_flat = jnp.transpose(x, (1, 0, 2)).reshape(C0, B * N0)

    grid = (B // batch_tile,)
    x_spec = pl.BlockSpec((C0, batch_tile * N0), lambda i: (0, i))
    o_spec = pl.BlockSpec((c_last, batch_tile * n_last), lambda i: (0, i))
    # Layer params are grid-invariant: full blocks with constant index_maps so
    # they are DMA'd to VMEM once and stay resident across grid steps.
    param_specs = [pl.BlockSpec(p.shape, lambda i, nd=p.ndim: (0,) * nd)
                   for p in flat_params]

    # Advisory cost estimate for the XLA scheduler around the custom call.
    flops = 0
    transcendentals = 0
    for (ci, co, wd, pp, ni) in layer_meta:
        flops += B * 2 * co * ci * wd * ni                  # conv matmuls
        transcendentals += B * co * ni                      # tanh
        if pp > 1:
            flops += B * (pp - 1) * co * ni                 # window max
            flops += 2 * co * (batch_tile * ni) * (batch_tile * ni // pp) \
                     * (B // batch_tile)                    # selection matmul
    bytes_accessed = 4 * (x.size + sum(int(p.size) for p in flat_params)
                          + B * c_last * n_last)

    kernel = functools.partial(_convnet_kernel,
                               layer_meta=tuple(layer_meta),
                               batch_tile=batch_tile)
    out_flat = pl.pallas_call(
        kernel,
        out_shape=jax.ShapeDtypeStruct((c_last, B * n_last), x.dtype),
        grid=grid,
        in_specs=[x_spec] + param_specs,
        out_specs=o_spec,
        compiler_params=pltpu.CompilerParams(
            dimension_semantics=("parallel",),
            vmem_limit_bytes=vmem_limit_bytes),
        cost_estimate=pl.CostEstimate(flops=flops,
                                      transcendentals=transcendentals,
                                      bytes_accessed=bytes_accessed),
    )(x_flat, *flat_params)

    # Layout plumbing back to the module's [B, C_last, N_last] output.
    return jnp.transpose(out_flat.reshape(c_last, B, n_last), (1, 0, 2))


# ----------------------- deterministic parameter init ------------------------

def init_params(key, c, n, w):
    """Per layer: Conv1d weight [c1, c0, w0], bias [c1], Saxpy a/b [c1, n1]."""
    params = []
    for i in range(len(w)):
        c0, c1, w0, n1 = c[i], c[i + 1], w[i], n[i + 1]
        key, k1, k2, k3, k4 = jax.random.split(key, 5)
        bound = 1.0 / jnp.sqrt(jnp.float32(c0 * w0))
        weight = jax.random.uniform(k1, (c1, c0, w0), jnp.float32, -bound, bound)
        bias = jax.random.uniform(k2, (c1,), jnp.float32, -bound, bound)
        sax_a = 1.0 + 0.1 * jax.random.normal(k3, (c1, n1), jnp.float32)
        sax_b = 0.1 * jax.random.normal(k4, (c1, n1), jnp.float32)
        params.append((weight, bias, sax_a, sax_b))
    return params


# ------------------------- pure-JAX reference check --------------------------

def reference_forward(x, params, pool_sizes):
    if x.ndim == 2:
        x = x.reshape(x.shape[0], 1, -1)
    for (w, b, a, c), p in zip(params, pool_sizes):
        Cout, Cin, W = w.shape
        lp = (W - 1) // 2
        rp = W - 1 - lp
        N = x.shape[-1]
        xpad = jnp.concatenate([x[..., N - lp:], x, x[..., :rp]], axis=-1)
        y = jax.lax.conv_general_dilated(
            xpad, w, window_strides=(1,), padding='VALID',
            dimension_numbers=('NCH', 'OIH', 'NCH'))
        y = jnp.tanh(y + b[None, :, None])
        B, C1, Nc = y.shape
        y = jnp.max(y.reshape(B, C1, Nc // p, p), axis=-1)
        x = a[None] * y + c[None]
    return x


# ---------------------------------- main --------------------------------------

if __name__ == "__main__":
    # layers = [C, N, W]  (matches ConvNet([[1,4,8],[16,8,4],[3,3]], activation=tanh,
    #                      pool='max', dropout=0.0, norm='Saxpy'))
    c, n, w = [1, 4, 8], [16, 8, 4], [3, 3]
    pool_sizes = [n[i] // n[i + 1] for i in range(len(w))]   # [2, 2]

    key = jax.random.PRNGKey(0)
    kx, kp = jax.random.split(key)
    x = jax.random.normal(kx, (2, 1, 16), jnp.float32)       # [B, C0, N0]
    params = init_params(kp, c, n, w)

    fwd = jax.jit(lambda xx: convnet_forward(xx, params, pool_sizes))
    out = jax.block_until_ready(fwd(x))                      # [B, C_last, N_last] = [2, 8, 4]

    ref = reference_forward(x, params, pool_sizes)
    assert out.shape == (2, 8, 4), out.shape
    err = float(jnp.max(jnp.abs(out - ref)))
    assert jnp.allclose(out, ref, rtol=1e-3, atol=1e-3), err
    print("KERNEL_OK")
</pallas_src>

<mosaic_0001>
module attributes {stable_mosaic.version = 11 : i64} {
  func.func @_convnet_kernel(%arg0: i32, %arg1: memref<1x32xf32, #tpu.memory_space<vmem>>, %arg2: memref<3x4x1xf32, #tpu.memory_space<vmem>>, %arg3: memref<4x1xf32, #tpu.memory_space<vmem>>, %arg4: memref<4x16xf32, #tpu.memory_space<vmem>>, %arg5: memref<4x16xf32, #tpu.memory_space<vmem>>, %arg6: memref<3x8x4xf32, #tpu.memory_space<vmem>>, %arg7: memref<8x1xf32, #tpu.memory_space<vmem>>, %arg8: memref<8x8xf32, #tpu.memory_space<vmem>>, %arg9: memref<8x8xf32, #tpu.memory_space<vmem>>, %arg10: memref<8x8xf32, #tpu.memory_space<vmem>>) attributes {dimension_semantics = [#tpu.dimension_semantics<parallel>], iteration_bounds = array<i64: 1>, scalar_prefetch = 0 : i64, scratch_operands = 0 : i64, tpu.core_type = #tpu.core_type<tc>, window_params = [{transform_indices = @transform_0, window_bounds = array<i64: 1, 32>}, {pipeline_mode = #tpu.pipeline_mode<synchronous>, transform_indices = @transform_1, window_bounds = array<i64: 3, 4, 1>}, {pipeline_mode = #tpu.pipeline_mode<synchronous>, transform_indices = @transform_2, window_bounds = array<i64: 4, 1>}, {pipeline_mode = #tpu.pipeline_mode<synchronous>, transform_indices = @transform_3, window_bounds = array<i64: 4, 16>}, {pipeline_mode = #tpu.pipeline_mode<synchronous>, transform_indices = @transform_4, window_bounds = array<i64: 4, 16>}, {pipeline_mode = #tpu.pipeline_mode<synchronous>, transform_indices = @transform_5, window_bounds = array<i64: 3, 8, 4>}, {pipeline_mode = #tpu.pipeline_mode<synchronous>, transform_indices = @transform_6, window_bounds = array<i64: 8, 1>}, {pipeline_mode = #tpu.pipeline_mode<synchronous>, transform_indices = @transform_7, window_bounds = array<i64: 8, 8>}, {pipeline_mode = #tpu.pipeline_mode<synchronous>, transform_indices = @transform_8, window_bounds = array<i64: 8, 8>}, {transform_indices = @transform_9, window_bounds = array<i64: 8, 8>}]} {
    %c0 = arith.constant 0 : index
    %c0_0 = arith.constant 0 : index
    %0 = vector.load %arg1[%c0, %c0_0] : memref<1x32xf32, #tpu.memory_space<vmem>>, vector<1x32xf32>
    %1 = tpu.iota {dimensions = array<i32: 1>} : vector<1x32xi32>
    %c16_i32 = arith.constant 16 : i32
    %c0_i32 = arith.constant 0 : i32
    %2 = arith.cmpi eq, %c16_i32, %c0_i32 : i32
    %c1_i32 = arith.constant 1 : i32
    %3 = arith.select %2, %c1_i32, %c16_i32 : i32
    %4 = vector.broadcast %3 : i32 to vector<1x32xi32>
    %5 = arith.remsi %1, %4 : vector<1x32xi32>
    %c0_i32_1 = arith.constant 0 : i32
    %6 = vector.broadcast %c0_i32_1 : i32 to vector<1x32xi32>
    %7 = arith.cmpi ne, %5, %6 : vector<1x32xi32>
    %c0_i32_2 = arith.constant 0 : i32
    %8 = vector.broadcast %c0_i32_2 : i32 to vector<1x32xi32>
    %9 = arith.cmpi slt, %5, %8 : vector<1x32xi32>
    %c0_i32_3 = arith.constant 0 : i32
    %10 = arith.cmpi slt, %3, %c0_i32_3 : i32
    %11 = vector.broadcast %10 : i1 to vector<1x32xi1>
    %12 = vector.broadcast %11 : vector<1x32xi1> to vector<1x32xi1>
    %13 = arith.xori %9, %12 : vector<1x32xi1>
    %14 = arith.andi %13, %7 : vector<1x32xi1>
    %15 = vector.broadcast %3 : i32 to vector<1x32xi32>
    %16 = arith.addi %5, %15 : vector<1x32xi32>
    %17 = arith.select %14, %16, %5 : vector<1x32xi1>, vector<1x32xi32>
    %18 = vector.extract_strided_slice %0 {offsets = [0, 15], sizes = [1, 17], strides = [1, 1]} : vector<1x32xf32> to vector<1x17xf32>
    %19 = vector.extract_strided_slice %0 {offsets = [0, 0], sizes = [1, 15], strides = [1, 1]} : vector<1x32xf32> to vector<1x15xf32>
    %20 = tpu.concatenate %18, %19 in 1 : vector<1x17xf32>, vector<1x15xf32> -> vector<1x32xf32>
    %21 = vector.extract_strided_slice %0 {offsets = [0, 31], sizes = [1, 1], strides = [1, 1]} : vector<1x32xf32> to vector<1x1xf32>
    %22 = vector.extract_strided_slice %0 {offsets = [0, 0], sizes = [1, 31], strides = [1, 1]} : vector<1x32xf32> to vector<1x31xf32>
    %23 = tpu.concatenate %21, %22 in 1 : vector<1x1xf32>, vector<1x31xf32> -> vector<1x32xf32>
    %c1_i32_4 = arith.constant 1 : i32
    %24 = vector.broadcast %c1_i32_4 : i32 to vector<1x32xi32>
    %25 = arith.cmpi slt, %17, %24 : vector<1x32xi32>
    %26 = arith.select %25, %20, %23 : vector<1x32xi1>, vector<1x32xf32>
    %c0_5 = arith.constant 0 : index
    %c0_6 = arith.constant 0 : index
    %c0_7 = arith.constant 0 : index
    %27 = vector.load %arg2[%c0_5, %c0_6, %c0_7] : memref<3x4x1xf32, #tpu.memory_space<vmem>>, vector<1x4x1xf32>
    %28 = vector.shape_cast %27 : vector<1x4x1xf32> to vector<4x1xf32>
    %cst = arith.constant dense<0.000000e+00> : vector<4x32xf32>
    %29 = tpu.matmul %28, %26, %cst {dimension_numbers = #tpu.dot_dimension_numbers<[1], [0], [0], [1], [0, 0, 1, 1], [], []>} : vector<4x1xf32>, vector<1x32xf32>, vector<4x32xf32> -> vector<4x32xf32>
    %c1 = arith.constant 1 : index
    %c0_8 = arith.constant 0 : index
    %c0_9 = arith.constant 0 : index
    %30 = vector.load %arg2[%c1, %c0_8, %c0_9] : memref<3x4x1xf32, #tpu.memory_space<vmem>>, vector<1x4x1xf32>
    %31 = vector.shape_cast %30 : vector<1x4x1xf32> to vector<4x1xf32>
    %cst_10 = arith.constant dense<0.000000e+00> : vector<4x32xf32>
    %32 = tpu.matmul %31, %0, %cst_10 {dimension_numbers = #tpu.dot_dimension_numbers<[1], [0], [0], [1], [0, 0, 1, 1], [], []>} : vector<4x1xf32>, vector<1x32xf32>, vector<4x32xf32> -> vector<4x32xf32>
    %33 = arith.addf %29, %32 : vector<4x32xf32>
    %34 = vector.extract_strided_slice %0 {offsets = [0, 1], sizes = [1, 31], strides = [1, 1]} : vector<1x32xf32> to vector<1x31xf32>
    %35 = vector.extract_strided_slice %0 {offsets = [0, 0], sizes = [1, 1], strides = [1, 1]} : vector<1x32xf32> to vector<1x1xf32>
    %36 = tpu.concatenate %34, %35 in 1 : vector<1x31xf32>, vector<1x1xf32> -> vector<1x32xf32>
    %37 = vector.extract_strided_slice %0 {offsets = [0, 17], sizes = [1, 15], strides = [1, 1]} : vector<1x32xf32> to vector<1x15xf32>
    %38 = vector.extract_strided_slice %0 {offsets = [0, 0], sizes = [1, 17], strides = [1, 1]} : vector<1x32xf32> to vector<1x17xf32>
    %39 = tpu.concatenate %37, %38 in 1 : vector<1x15xf32>, vector<1x17xf32> -> vector<1x32xf32>
    %c15_i32 = arith.constant 15 : i32
    %40 = vector.broadcast %c15_i32 : i32 to vector<1x32xi32>
    %41 = arith.cmpi slt, %17, %40 : vector<1x32xi32>
    %42 = arith.select %41, %36, %39 : vector<1x32xi1>, vector<1x32xf32>
    %c2 = arith.constant 2 : index
    %c0_11 = arith.constant 0 : index
    %c0_12 = arith.constant 0 : index
    %43 = vector.load %arg2[%c2, %c0_11, %c0_12] : memref<3x4x1xf32, #tpu.memory_space<vmem>>, vector<1x4x1xf32>
    %44 = vector.shape_cast %43 : vector<1x4x1xf32> to vector<4x1xf32>
    %cst_13 = arith.constant dense<0.000000e+00> : vector<4x32xf32>
    %45 = tpu.matmul %44, %42, %cst_13 {dimension_numbers = #tpu.dot_dimension_numbers<[1], [0], [0], [1], [0, 0, 1, 1], [], []>} : vector<4x1xf32>, vector<1x32xf32>, vector<4x32xf32> -> vector<4x32xf32>
    %46 = arith.addf %33, %45 : vector<4x32xf32>
    %c0_14 = arith.constant 0 : index
    %c0_15 = arith.constant 0 : index
    %47 = vector.load %arg3[%c0_14, %c0_15] : memref<4x1xf32, #tpu.memory_space<vmem>>, vector<4x1xf32>
    %48 = vector.broadcast %47 : vector<4x1xf32> to vector<4x32xf32>
    %49 = arith.addf %46, %48 : vector<4x32xf32>
    %50 = math.tanh %49 : vector<4x32xf32>
    %51 = vector.extract_strided_slice %50 {offsets = [0, 1], sizes = [4, 31], strides = [1, 1]} : vector<4x32xf32> to vector<4x31xf32>
    %52 = vector.extract_strided_slice %50 {offsets = [0, 0], sizes = [4, 1], strides = [1, 1]} : vector<4x32xf32> to vector<4x1xf32>
    %53 = tpu.concatenate %51, %52 in 1 : vector<4x31xf32>, vector<4x1xf32> -> vector<4x32xf32>
    %54 = arith.maximumf %50, %53 : vector<4x32xf32>
    %55 = tpu.iota {dimensions = array<i32: 0>} : vector<32x16xi32>
    %56 = tpu.iota {dimensions = array<i32: 1>} : vector<32x16xi32>
    %c2_i32 = arith.constant 2 : i32
    %57 = vector.broadcast %c2_i32 : i32 to vector<32x16xi32>
    %58 = arith.muli %56, %57 : vector<32x16xi32>
    %59 = arith.cmpi eq, %55, %58 : vector<32x16xi32>
    %60 = arith.extui %59 : vector<32x16xi1> to vector<32x16xi32>
    %61 = arith.sitofp %60 : vector<32x16xi32> to vector<32x16xf32>
    %cst_16 = arith.constant dense<0.000000e+00> : vector<4x16xf32>
    %62 = tpu.matmul %54, %61, %cst_16 {dimension_numbers = #tpu.dot_dimension_numbers<[1], [0], [0], [1], [0, 0, 1, 1], [], []>} : vector<4x32xf32>, vector<32x16xf32>, vector<4x16xf32> -> vector<4x16xf32>
    %c0_17 = arith.constant 0 : index
    %c0_18 = arith.constant 0 : index
    %63 = vector.load %arg4[%c0_17, %c0_18] : memref<4x16xf32, #tpu.memory_space<vmem>>, vector<4x16xf32>
    %64 = arith.mulf %63, %62 : vector<4x16xf32>
    %c0_19 = arith.constant 0 : index
    %c0_20 = arith.constant 0 : index
    %65 = vector.load %arg5[%c0_19, %c0_20] : memref<4x16xf32, #tpu.memory_space<vmem>>, vector<4x16xf32>
    %66 = arith.addf %64, %65 : vector<4x16xf32>
    %67 = tpu.iota {dimensions = array<i32: 1>} : vector<1x16xi32>
    %c8_i32 = arith.constant 8 : i32
    %c0_i32_21 = arith.constant 0 : i32
    %68 = arith.cmpi eq, %c8_i32, %c0_i32_21 : i32
    %c1_i32_22 = arith.constant 1 : i32
    %69 = arith.select %68, %c1_i32_22, %c8_i32 : i32
    %70 = vector.broadcast %69 : i32 to vector<1x16xi32>
    %71 = arith.remsi %67, %70 : vector<1x16xi32>
    %c0_i32_23 = arith.constant 0 : i32
    %72 = vector.broadcast %c0_i32_23 : i32 to vector<1x16xi32>
    %73 = arith.cmpi ne, %71, %72 : vector<1x16xi32>
    %c0_i32_24 = arith.constant 0 : i32
    %74 = vector.broadcast %c0_i32_24 : i32 to vector<1x16xi32>
    %75 = arith.cmpi slt, %71, %74 : vector<1x16xi32>
    %c0_i32_25 = arith.constant 0 : i32
    %76 = arith.cmpi slt, %69, %c0_i32_25 : i32
    %77 = vector.broadcast %76 : i1 to vector<1x16xi1>
    %78 = vector.broadcast %77 : vector<1x16xi1> to vector<1x16xi1>
    %79 = arith.xori %75, %78 : vector<1x16xi1>
    %80 = arith.andi %79, %73 : vector<1x16xi1>
    %81 = vector.broadcast %69 : i32 to vector<1x16xi32>
    %82 = arith.addi %71, %81 : vector<1x16xi32>
    %83 = arith.select %80, %82, %71 : vector<1x16xi1>, vector<1x16xi32>
    %84 = vector.extract_strided_slice %66 {offsets = [0, 7], sizes = [4, 9], strides = [1, 1]} : vector<4x16xf32> to vector<4x9xf32>
    %85 = vector.extract_strided_slice %66 {offsets = [0, 0], sizes = [4, 7], strides = [1, 1]} : vector<4x16xf32> to vector<4x7xf32>
    %86 = tpu.concatenate %84, %85 in 1 : vector<4x9xf32>, vector<4x7xf32> -> vector<4x16xf32>
    %87 = vector.extract_strided_slice %66 {offsets = [0, 15], sizes = [4, 1], strides = [1, 1]} : vector<4x16xf32> to vector<4x1xf32>
    %88 = vector.extract_strided_slice %66 {offsets = [0, 0], sizes = [4, 15], strides = [1, 1]} : vector<4x16xf32> to vector<4x15xf32>
    %89 = tpu.concatenate %87, %88 in 1 : vector<4x1xf32>, vector<4x15xf32> -> vector<4x16xf32>
    %c1_i32_26 = arith.constant 1 : i32
    %90 = vector.broadcast %c1_i32_26 : i32 to vector<1x16xi32>
    %91 = arith.cmpi slt, %83, %90 : vector<1x16xi32>
    %92 = vector.shape_cast %91 : vector<1x16xi1> to vector<1x16xi1>
    %93 = vector.broadcast %92 : vector<1x16xi1> to vector<4x16xi1>
    %94 = arith.select %93, %86, %89 : vector<4x16xi1>, vector<4x16xf32>
    %c0_27 = arith.constant 0 : index
    %c0_28 = arith.constant 0 : index
    %c0_29 = arith.constant 0 : index
    %95 = vector.load %arg6[%c0_27, %c0_28, %c0_29] : memref<3x8x4xf32, #tpu.memory_space<vmem>>, vector<1x8x4xf32>
    %96 = vector.shape_cast %95 : vector<1x8x4xf32> to vector<8x4xf32>
    %cst_30 = arith.constant dense<0.000000e+00> : vector<8x16xf32>
    %97 = tpu.matmul %96, %94, %cst_30 {dimension_numbers = #tpu.dot_dimension_numbers<[1], [0], [0], [1], [0, 0, 1, 1], [], []>} : vector<8x4xf32>, vector<4x16xf32>, vector<8x16xf32> -> vector<8x16xf32>
    %c1_31 = arith.constant 1 : index
    %c0_32 = arith.constant 0 : index
    %c0_33 = arith.constant 0 : index
    %98 = vector.load %arg6[%c1_31, %c0_32, %c0_33] : memref<3x8x4xf32, #tpu.memory_space<vmem>>, vector<1x8x4xf32>
    %99 = vector.shape_cast %98 : vector<1x8x4xf32> to vector<8x4xf32>
    %cst_34 = arith.constant dense<0.000000e+00> : vector<8x16xf32>
    %100 = tpu.matmul %99, %66, %cst_34 {dimension_numbers = #tpu.dot_dimension_numbers<[1], [0], [0], [1], [0, 0, 1, 1], [], []>} : vector<8x4xf32>, vector<4x16xf32>, vector<8x16xf32> -> vector<8x16xf32>
    %101 = arith.addf %97, %100 : vector<8x16xf32>
    %102 = vector.extract_strided_slice %66 {offsets = [0, 1], sizes = [4, 15], strides = [1, 1]} : vector<4x16xf32> to vector<4x15xf32>
    %103 = vector.extract_strided_slice %66 {offsets = [0, 0], sizes = [4, 1], strides = [1, 1]} : vector<4x16xf32> to vector<4x1xf32>
    %104 = tpu.concatenate %102, %103 in 1 : vector<4x15xf32>, vector<4x1xf32> -> vector<4x16xf32>
    %105 = vector.extract_strided_slice %66 {offsets = [0, 9], sizes = [4, 7], strides = [1, 1]} : vector<4x16xf32> to vector<4x7xf32>
    %106 = vector.extract_strided_slice %66 {offsets = [0, 0], sizes = [4, 9], strides = [1, 1]} : vector<4x16xf32> to vector<4x9xf32>
    %107 = tpu.concatenate %105, %106 in 1 : vector<4x7xf32>, vector<4x9xf32> -> vector<4x16xf32>
    %c7_i32 = arith.constant 7 : i32
    %108 = vector.broadcast %c7_i32 : i32 to vector<1x16xi32>
    %109 = arith.cmpi slt, %83, %108 : vector<1x16xi32>
    %110 = vector.shape_cast %109 : vector<1x16xi1> to vector<1x16xi1>
    %111 = vector.broadcast %110 : vector<1x16xi1> to vector<4x16xi1>
    %112 = arith.select %111, %104, %107 : vector<4x16xi1>, vector<4x16xf32>
    %c2_35 = arith.constant 2 : index
    %c0_36 = arith.constant 0 : index
    %c0_37 = arith.constant 0 : index
    %113 = vector.load %arg6[%c2_35, %c0_36, %c0_37] : memref<3x8x4xf32, #tpu.memory_space<vmem>>, vector<1x8x4xf32>
    %114 = vector.shape_cast %113 : vector<1x8x4xf32> to vector<8x4xf32>
    %cst_38 = arith.constant dense<0.000000e+00> : vector<8x16xf32>
    %115 = tpu.matmul %114, %112, %cst_38 {dimension_numbers = #tpu.dot_dimension_numbers<[1], [0], [0], [1], [0, 0, 1, 1], [], []>} : vector<8x4xf32>, vector<4x16xf32>, vector<8x16xf32> -> vector<8x16xf32>
    %116 = arith.addf %101, %115 : vector<8x16xf32>
    %c0_39 = arith.constant 0 : index
    %c0_40 = arith.constant 0 : index
    %117 = vector.load %arg7[%c0_39, %c0_40] : memref<8x1xf32, #tpu.memory_space<vmem>>, vector<8x1xf32>
    %118 = vector.broadcast %117 : vector<8x1xf32> to vector<8x16xf32>
    %119 = arith.addf %116, %118 : vector<8x16xf32>
    %120 = math.tanh %119 : vector<8x16xf32>
    %121 = vector.extract_strided_slice %120 {offsets = [0, 1], sizes = [8, 15], strides = [1, 1]} : vector<8x16xf32> to vector<8x15xf32>
    %122 = vector.extract_strided_slice %120 {offsets = [0, 0], sizes = [8, 1], strides = [1, 1]} : vector<8x16xf32> to vector<8x1xf32>
    %123 = tpu.concatenate %121, %122 in 1 : vector<8x15xf32>, vector<8x1xf32> -> vector<8x16xf32>
    %124 = arith.maximumf %120, %123 : vector<8x16xf32>
    %125 = tpu.iota {dimensions = array<i32: 0>} : vector<16x8xi32>
    %126 = tpu.iota {dimensions = array<i32: 1>} : vector<16x8xi32>
    %c2_i32_41 = arith.constant 2 : i32
    %127 = vector.broadcast %c2_i32_41 : i32 to vector<16x8xi32>
    %128 = arith.muli %126, %127 : vector<16x8xi32>
    %129 = arith.cmpi eq, %125, %128 : vector<16x8xi32>
    %130 = arith.extui %129 : vector<16x8xi1> to vector<16x8xi32>
    %131 = arith.sitofp %130 : vector<16x8xi32> to vector<16x8xf32>
    %cst_42 = arith.constant dense<0.000000e+00> : vector<8x8xf32>
    %132 = tpu.matmul %124, %131, %cst_42 {dimension_numbers = #tpu.dot_dimension_numbers<[1], [0], [0], [1], [0, 0, 1, 1], [], []>} : vector<8x16xf32>, vector<16x8xf32>, vector<8x8xf32> -> vector<8x8xf32>
    %c0_43 = arith.constant 0 : index
    %c0_44 = arith.constant 0 : index
    %133 = vector.load %arg8[%c0_43, %c0_44] : memref<8x8xf32, #tpu.memory_space<vmem>>, vector<8x8xf32>
    %134 = arith.mulf %133, %132 : vector<8x8xf32>
    %c0_45 = arith.constant 0 : index
    %c0_46 = arith.constant 0 : index
    %135 = vector.load %arg9[%c0_45, %c0_46] : memref<8x8xf32, #tpu.memory_space<vmem>>, vector<8x8xf32>
    %136 = arith.addf %134, %135 : vector<8x8xf32>
    %c0_47 = arith.constant 0 : index
    %c0_48 = arith.constant 0 : index
    %137 = vector.load %arg10[%c0_47, %c0_48] : memref<8x8xf32, #tpu.memory_space<vmem>>, vector<8x8xf32>
    tpu.vector_store %arg10[%c0_47, %c0_48], %136 {strides = array<i32>} : memref<8x8xf32, #tpu.memory_space<vmem>>, vector<8x8xf32>,
    return
  }
  func.func @transform_0(%arg0: i32) -> (i32, i32) {
    %c0_i32 = arith.constant 0 : i32
    %c0_i32_0 = arith.constant 0 : i32
    return %c0_i32, %arg0 : i32, i32
  }
  func.func @transform_1(%arg0: i32) -> (i32, i32, i32) {
    %c0_i32 = arith.constant 0 : i32
    %c0_i32_0 = arith.constant 0 : i32
    %c0_i32_1 = arith.constant 0 : i32
    %c0_i32_2 = arith.constant 0 : i32
    return %c0_i32, %c0_i32_0, %c0_i32_1 : i32, i32, i32
  }
  func.func @transform_2(%arg0: i32) -> (i32, i32) {
    %c0_i32 = arith.constant 0 : i32
    %c0_i32_0 = arith.constant 0 : i32
    %c0_i32_1 = arith.constant 0 : i32
    return %c0_i32, %c0_i32_0 : i32, i32
  }
  func.func @transform_3(%arg0: i32) -> (i32, i32) {
    %c0_i32 = arith.constant 0 : i32
    %c0_i32_0 = arith.constant 0 : i32
    %c0_i32_1 = arith.constant 0 : i32
    return %c0_i32, %c0_i32_0 : i32, i32
  }
  func.func @transform_4(%arg0: i32) -> (i32, i32) {
    %c0_i32 = arith.constant 0 : i32
    %c0_i32_0 = arith.constant 0 : i32
    %c0_i32_1 = arith.constant 0 : i32
    return %c0_i32, %c0_i32_0 : i32, i32
  }
  func.func @transform_5(%arg0: i32) -> (i32, i32, i32) {
    %c0_i32 = arith.constant 0 : i32
    %c0_i32_0 = arith.constant 0 : i32
    %c0_i32_1 = arith.constant 0 : i32
    %c0_i32_2 = arith.constant 0 : i32
    return %c0_i32, %c0_i32_0, %c0_i32_1 : i32, i32, i32
  }
  func.func @transform_6(%arg0: i32) -> (i32, i32) {
    %c0_i32 = arith.constant 0 : i32
    %c0_i32_0 = arith.constant 0 : i32
    %c0_i32_1 = arith.constant 0 : i32
    return %c0_i32, %c0_i32_0 : i32, i32
  }
  func.func @transform_7(%arg0: i32) -> (i32, i32) {
    %c0_i32 = arith.constant 0 : i32
    %c0_i32_0 = arith.constant 0 : i32
    %c0_i32_1 = arith.constant 0 : i32
    return %c0_i32, %c0_i32_0 : i32, i32
  }
  func.func @transform_8(%arg0: i32) -> (i32, i32) {
    %c0_i32 = arith.constant 0 : i32
    %c0_i32_0 = arith.constant 0 : i32
    %c0_i32_1 = arith.constant 0 : i32
    return %c0_i32, %c0_i32_0 : i32, i32
  }
  func.func @transform_9(%arg0: i32) -> (i32, i32) {
    %c0_i32 = arith.constant 0 : i32
    %c0_i32_0 = arith.constant 0 : i32
    return %c0_i32, %arg0 : i32, i32
  }
}

</mosaic_0001>

<bundles_post_ra>
// kernel: tile.19
= control target key start
LH: loop header
LB: loop body
LE: loop exit
PB: predicated region body
PF: predicated region fallthrough
CT: control target
= control target key end

     0   :  { %vm21_vm0 = vcmask 64512   ;;  %vm27_vm1 = vcmask 130112   ;;  %s67_s0 = inlined_call_operand.vmem [shape: f32[4,2,8], index: 0, kind: input, shape index: {}]   ;;  %s68_s1 = inlined_call_operand.vmem [shape: f32[4,16], index: 1, kind: output, shape index: {}]  }
   0x1   :  { %v37_v0 = vld [vmem:[%s67_s0 + $0x6] sm:$0x3]  ;;  %v38_v1 = vld [vmem:[%s67_s0 + $0x4] sm:$0x3]  ;;  %v39_v2 = vld [vmem:[%s67_s0 + $0x2] sm:$0x3] }
   0x2   :  { %8 = vst [vmem:[#allocation1 + $0x18] sm:$0x3] %v37_v0  ;;  %13 = vst [vmem:[#allocation1 + $0x10] sm:$0x3] %v38_v1  ;;  %v18_v3 = vld [vmem:[%s67_s0] sm:$0x3] }
   0x3   :  { %17 = vst [vmem:[#allocation1 + $0x8] sm:$0x3] %v39_v2  ;;  %19 = vst [vmem:[#allocation1] sm:$0x3] %v18_v3  ;;  %s41_s0 = smov 8  }
   0xa   :  { %v24_v4 = vld [vmem:[#allocation1 + $0x1] ss:$8 sm:$0xf]   ;;  %v20_v5 = vld [vmem:[#allocation1] ss:$8 sm:$0xf]  }
   0xb   :  { %25 = vrot.lane.b32.xlu0 %v24_v4, %s41_s0  ;;  %22 = vst.msk [vmem:[#allocation0] sm:$0xf] %vm21_vm0, %v20_v5  }
  0x7d   :  { %v26_v6 = vpop.permute.xlu0 %25  }
  0x7e   :  { %28 = vst.msk [vmem:[#allocation0] sm:$0xf] %vm27_vm1, %v26_v6  }
  0x85   :  { %v32_v7 = vld [vmem:[#allocation0] sm:$0xf] }
  0x86   :  { %34 = vst [vmem:[%s68_s1] sm:$0xf] %v32_v7 }

// kernel: _lambda_.1
= control target key start
LH: loop header
LB: loop body
LE: loop exit
PB: predicated region body
PF: predicated region fallthrough
CT: control target
= control target key end

     0   :  { %v33_v0 = vlaneseq  ;;  %v949_v2 = vmov 0.0   ;;  %vm76_vm0 = vcmask 1040384   ;;  %vm66_vm1 = vcmask 7168   ;;  %s951_s12 = smov 97   ;;  %s952_s13 = smov 113   ;;  %s1138_s0 = inlined_call_operand.vmem [shape: f32[1,32], index: 0, kind: input, shape index: {}]   ;;  %s1139_s1 = inlined_call_operand.vmem [shape: f32[3,4,1], index: 1, kind: input, shape index: {}]   ;;  %s1140_s2 = inlined_call_operand.vmem [shape: f32[4,1], index: 2, kind: input, shape index: {}]   ;;  %s1141_s3 = inlined_call_operand.vmem [shape: f32[4,16], index: 3, kind: input, shape index: {}]   ;;  %s1142_s4 = inlined_call_operand.vmem [shape: f32[4,16], index: 4, kind: input, shape index: {}]   ;;  %s1143_s5 = inlined_call_operand.vmem [shape: f32[3,8,4], index: 5, kind: input, shape index: {}]   ;;  %s1144_s6 = inlined_call_operand.vmem [shape: f32[8,1], index: 6, kind: input, shape index: {}]   ;;  %s1145_s7 = inlined_call_operand.vmem [shape: f32[8,8], index: 7, kind: input, shape index: {}]   ;;  %s1146_s8 = inlined_call_operand.vmem [shape: f32[8,8], index: 8, kind: input, shape index: {}]   ;;  %s1147_s9 = inlined_call_operand.vmem [shape: f32[8,8], index: 9, kind: output, shape index: {}]  }
   0x1   :  { %v32_v1 = vld [vmem:[%s1138_s0] sm:$0x1]  ;;  %875 = vmatprep.subr.mxu1 %v949_v2  ;;  %870 = vmatprep.subr.mxu0 %v949_v2  ;;  %vm950_vm2 = vmmov 0   ;;  %v822_v5 = vld [vmem:[%s1139_s1 + $0x4] sm:$0xf]  ;;  %v953_v7 = vmov 0  }
   0x2   :  { %v1021_v3 = vshrl.u32 %v33_v0, 7  ;;  %871 = vmatpush3.msk.msra.mxu0 %vm76_vm0, %v32_v1  ;;  %872 = vmatprep.mubr.msk.f32.mxu0 %vm950_vm2, %v949_v2  ;;  %s954_s14 = smov 1   ;;  %s955_s15 = smov 17   ;;  %v322_v8 = vld [vmem:[%s1140_s2] sm:$0xf]  ;;  %v1044_v9 = vand.u32 127, %v33_v0 }
   0x3   :  { %880 = vmatprep.subr.mxu0 %v949_v2  ;;  %877 = vmatprep.mubr.msk.f32.mxu1 %vm950_vm2, %v949_v2  ;;  %s956_s16 = smov 31   ;;  %s957_s17 = smov 127   ;;  %vm58_vm3 = vcmask 138240   ;;  %v70_v17 = vld [vmem:[%s1139_s1] sm:$0xf]  ;;  %vm231_vm5 = vcmask 252928  }
   0x4   :  { %v50_v4 = vsub.s32 0, %v1021_v3  ;;  %873 = vmatmul.mubr.msk.f32.vlgmr.msra.gmra.mrb[0].mxu0 %vm66_vm1, %v822_v5  ;;  %944 = vset.pattern.permute.xlu0 %v953_v7  ;;  %s958_s18 = smov 15   ;;  %s959_s19 = smov 111   ;;  %v39_v10 = vand.u32 15, %v1044_v9  ;;  %vm239_vm6 = vcmask 121856   ;;  %v960_v29 = vmov 0.0|0.0  }
   0x5   :  { %882 = vmatprep.mubr.msk.f32.mxu0 %vm950_vm2, %v949_v2  ;;  %v827_v25 = vld [vmem:[%s1139_s1 + $0x8] sm:$0xf]  ;;  %v341_v33 = vadd.s32 8, %v1021_v3  ;;  %v344_v34 = vmul.u32 2, %v1044_v9  ;;  %v961_v41 = vmov 1.0|1.0  }
   0x6   :  { %v51_v6 = vrot.slane %v32_v1, %v50_v4  ;;  %vm68_vm4 = vcmp.lt.s32.totalorder %v39_v10, 1  ;;  %vm241_vm7 = vcmp.lt.s32.totalorder %v39_v10, 15  ;;  %v342_v42 = vadd.s32 16, %v1021_v3  ;;  %v431_v49 = vld [vmem:[%s1141_s3] sm:$0xf]  ;;  %v839_v55 = vld [vmem:[%s1143_s5 + $0x8] sm:$0xff] }
   0x7   :  { %vm345_vm8 = vcmp.eq.s32.totalorder %v1021_v3, %v344_v34  ;;  %vm346_vm9 = vcmp.eq.s32.totalorder %v341_v33, %v344_v34  ;;  %v343_v43 = vadd.s32 24, %v1021_v3  ;;  %vm357_vm14 = vcmask 261120   ;;  %v433_v51 = vld [vmem:[%s1142_s4] sm:$0xf]  ;;  %s962_s30 = smov 9   ;;  %s963_s10 = smov 121  }
   0x8   :  { %60 = vrot.lane.b32.xlu1 %v51_v6, %s951_s12  ;;  %52 = vrot.lane.b32.xlu0 %v51_v6, %s952_s13  ;;  %vm1069_vm10 = vmpackc.low %vm346_vm9, %vm345_vm8  ;;  %vm347_vm11 = vcmp.eq.s32.totalorder %v342_v42, %v344_v34  ;;  %vm474_vm15 = vcmask 1043456   ;;  %s964_s3 = smov 7   ;;  %s965_s4 = smov 119   ;;  %v721_v56 = vld [vmem:[%s1144_s6] sm:$0xff]  ;;  %v439_v57 = vand.u32 7, %v1044_v9  ;;  %v844_v9 = vld [vmem:[%s1143_s5 + $0x10] sm:$0xff] }
   0x9   :  { %vm348_vm12 = vcmp.eq.s32.totalorder %v343_v43, %v344_v34  ;;  %v467_v0 = vld [vmem:[%s1143_s5] sm:$0xff] }
   0xa   :  { %vm922_vm13 = vmpackc.low %vm348_vm12, %vm347_vm11 }
   0xc   :  { %63 = vrot.lane.b32.xlu1 %v51_v6, %s954_s14  ;;  %55 = vrot.lane.b32.xlu0 %v51_v6, %s955_s15 }
  0x10   :  { %228 = vrot.lane.b32.xlu1 %v51_v6, %s956_s16  ;;  %225 = vrot.lane.b32.xlu0 %v51_v6, %s957_s17 }
  0x14   :  { %236 = vrot.lane.b32.xlu1 %v51_v6, %s958_s18  ;;  %233 = vrot.lane.b32.xlu0 %v51_v6, %s959_s19 }
  0x18   :  { %325 = vperm.xlu0 %944, %v322_v8  }
  0x7a   :  { %v61_v11 = vpop.permute.xlu1 %60  ;;  %v53_v12 = vpop.permute.xlu0 %52 }
  0x7e   :  { %v64_v13 = vpop.permute.xlu1 %63  ;;  %v56_v14 = vpop.permute.xlu0 %55 }
  0x7f   :  { %v67_v15 = vsel %vm66_vm1, %v61_v11, %v64_v13  ;;  %v59_v16 = vsel %vm58_vm3, %v53_v12, %v56_v14  ;;  %vm454_vm3 = vcmask 72704  }
  0x80   :  { %v69_v18 = vsel %vm68_vm4, %v59_v16, %v67_v15  ;;  %vm463_vm4 = vcmp.lt.s32.totalorder %v439_v57, 1 }
  0x81   :  { %876 = vmatpush3.msk.msra.mxu1 %vm76_vm0, %v69_v18 }
  0x82   :  { %v229_v19 = vpop.permute.xlu1 %228  ;;  %v226_v20 = vpop.permute.xlu0 %225  ;;  %878 = vmatmul.mubr.msk.f32.vlgmr.msra.gmra.mrb[0].mxu1 %vm66_vm1, %v70_v17  ;;  %918 = vmatprep.subr.bf16.mxu1 %v960_v29 }
  0x83   :  { %893 = vmatprep.mubr.msk.f32.mxu1 %vm950_vm2, %v949_v2  ;;  %v232_v23 = vsel %vm231_vm5, %v226_v20, %v229_v19  ;;  %920 = vmatpush3.bf16.msk.msra.mxu1 %vm1069_vm10, %v961_v41 }
  0x84   :  { %921 = vmatprep.subr.bf16.mxu1 %v960_v29 }
  0x86   :  { %v237_v21 = vpop.permute.xlu1 %236  ;;  %v234_v22 = vpop.permute.xlu0 %233 }
  0x87   :  { %v240_v24 = vsel %vm239_vm6, %v234_v22, %v237_v21  ;;  %923 = vmatpush3.bf16.msk.msra.mxu1 %vm922_vm13, %v961_v41 }
  0x88   :  { %v242_v26 = vsel %vm241_vm7, %v232_v23, %v240_v24  ;;  %906 = vmatprep.subr.mxu1 %v949_v2  ;;  %vm816_vm7 = vcmask 64512  }
  0x89   :  { %881 = vmatpush3.msk.msra.mxu0 %vm76_vm0, %v242_v26  ;;  %vm470_vm0 = vcmask 31744  }
  0x8a   :  { %883 = vmatmul.mubr.msk.f32.vlgmr.msra.gmra.mrb[2].mxu0 %vm66_vm1, %v827_v25  ;;  %896 = vmatprep.subr.mxu0 %v949_v2  ;;  %v812_v25 = vld [vmem:[%s1145_s7] sm:$0xff] }
  0x8b   :  { %898 = vmatprep.mubr.msk.f32.mxu0 %vm950_vm2, %v949_v2 }
  0x97   :  { %v326_v36 = vpop.permute.xlu0 %325 }
  0xd7   :  { %v145_v27 = vpop.f32.mrb[0].mxu0 }
  0xd8   :  { %v874_v28 = vpop.f32.mrb[1].mxu0 }
 0x155   :  { %v221_v30 = vpop.f32.mrb[0].mxu1 }
 0x156   :  { %v222_v31 = vadd.f32 %v221_v30, %v145_v27  ;;  %v879_v32 = vpop.f32.mrb[1].mxu1  ;;  %v814_v27 = vld [vmem:[%s1146_s8] sm:$0xff] }
 0x15d   :  { %v317_v35 = vpop.f32.mrb[2].mxu0 }
 0x15e   :  { %v321_v37 = vadd.f32 %v317_v35, %v222_v31  ;;  %v884_v38 = vpop.f32.mrb[3].mxu0 }
 0x160   :  { %v328_v40 = vadd.f32 %v326_v36, %v321_v37 }
 0x162   :  { %945 = vtanh.f32 %v328_v40 }
 0x16c   :  { %v946_v44 = vpop.eup %945 }
 0x16d   :  { %331 = vrot.lane.b32.xlu1 %v946_v44, %s957_s17 }
 0x171   :  { %334 = vrot.lane.b32.xlu1 %v946_v44, %s956_s16 }
 0x1df   :  { %v332_v45 = vpop.permute.xlu1 %331 }
 0x1e3   :  { %v335_v46 = vpop.permute.xlu1 %334 }
 0x1e4   :  { %v337_v47 = vsel %vm231_vm5, %v332_v45, %v335_v46  ;;  %vm638_vm5 = vcmp.lt.s32.totalorder %v439_v57, 7 }
 0x1e5   :  { %v338_v48 = vmax.f32 %v946_v44, %v337_v47 }
 0x1e7   :  { %894 = vmatmul.mubr.msk.f32.vlgmr.msra.gmra.mrb[2].mxu1 %vm357_vm14, %v338_v48 }
 0x1e8   :  { %908 = vmatprep.mubr.msk.f32.mxu1 %vm950_vm2, %v949_v2 }
 0x2ba   :  { %v427_v50 = vpop.f32.mrb[2].mxu1 }
 0x2bb   :  { %v432_v52 = vmul.f32 %v431_v49, %v427_v50  ;;  %v895_v53 = vpop.f32.mrb[3].mxu1 }
 0x2bd   :  { %v434_v54 = vadd.f32 %v433_v51, %v432_v52 }
 0x2bf   :  { %451 = vrot.lane.b32.xlu1 %v434_v54, %s962_s30  ;;  %448 = vrot.lane.b32.xlu0 %v434_v54, %s963_s10 }
 0x2c0   :  { %897 = vmatpush3.msk.msra.mxu0 %vm474_vm15, %v434_v54 }
 0x2c1   :  { %901 = vmatprep.subr.mxu0 %v949_v2  ;;  %899 = vmatmul.mubr.msk.f32.vlgmr.msra.gmra.mrb[4].mxu0 %vm470_vm0, %v839_v55 }
 0x2c2   :  { %903 = vmatprep.mubr.msk.f32.mxu0 %vm950_vm2, %v949_v2 }
 0x2c3   :  { %459 = vrot.lane.b32.xlu1 %v434_v54, %s954_s14  ;;  %456 = vrot.lane.b32.xlu0 %v434_v54, %s952_s13 }
 0x2c7   :  { %626 = vrot.lane.b32.xlu1 %v434_v54, %s958_s18  ;;  %623 = vrot.lane.b32.xlu0 %v434_v54, %s957_s17 }
 0x2cb   :  { %633 = vrot.lane.b32.xlu1 %v434_v54, %s964_s3  ;;  %630 = vrot.lane.b32.xlu0 %v434_v54, %s965_s4 }
 0x2cf   :  { %724 = vperm.xlu0 %944, %v721_v56  }
 0x331   :  { %v452_v58 = vpop.permute.xlu1 %451  ;;  %v449_v59 = vpop.permute.xlu0 %448 }
 0x332   :  { %v455_v62 = vsel %vm454_vm3, %v449_v59, %v452_v58 }
 0x335   :  { %v460_v60 = vpop.permute.xlu1 %459  ;;  %v457_v61 = vpop.permute.xlu0 %456 }
 0x336   :  { %v462_v63 = vsel %vm66_vm1, %v457_v61, %v460_v60  ;;  %vm636_vm1 = vcmask 56320  }
 0x337   :  { %v466_v1 = vsel %vm463_vm4, %v455_v62, %v462_v63 }
 0x338   :  { %902 = vmatpush3.msk.msra.mxu0 %vm474_vm15, %v466_v1 }
 0x339   :  { %v627_v3 = vpop.permute.xlu1 %626  ;;  %v624_v4 = vpop.permute.xlu0 %623  ;;  %904 = vmatmul.mubr.msk.f32.vlgmr.msra.gmra.mrb[6].mxu0 %vm470_vm0, %v467_v0  ;;  %924 = vmatprep.subr.bf16.mxu0 %v960_v29 }
 0x33a   :  { %926 = vmatpush3.bf16.msk.msra.mxu0 %vm1069_vm10, %v961_v41  ;;  %915 = vmatprep.mubr.msk.f32.mxu0 %vm950_vm2, %v949_v2  ;;  %v629_v7 = vsel %vm239_vm6, %v624_v4, %v627_v3  ;;  %vm738_vm2 = vcmask 130048  }
 0x33d   :  { %v634_v5 = vpop.permute.xlu1 %633  ;;  %v631_v6 = vpop.permute.xlu0 %630 }
 0x33e   :  { %v637_v8 = vsel %vm636_vm1, %v631_v6, %v634_v5 }
 0x33f   :  { %v641_v10 = vsel %vm638_vm5, %v629_v7, %v637_v8 }
 0x340   :  { %907 = vmatpush3.msk.msra.mxu1 %vm474_vm15, %v641_v10 }
 0x341   :  { %909 = vmatmul.mubr.msk.f32.vlgmr.msra.gmra.mrb[4].mxu1 %vm470_vm0, %v844_v9 }
 0x34e   :  { %v725_v18 = vpop.permute.xlu0 %724 }
 0x394   :  { %v543_v11 = vpop.f32.mrb[4].mxu0 }
 0x395   :  { %v900_v12 = vpop.f32.mrb[5].mxu0 }
 0x40c   :  { %v619_v13 = vpop.f32.mrb[6].mxu0 }
 0x40d   :  { %v620_v2 = vadd.f32 %v619_v13, %v543_v11  ;;  %v905_v14 = vpop.f32.mrb[7].mxu0 }
 0x414   :  { %v716_v15 = vpop.f32.mrb[4].mxu1 }
 0x415   :  { %v720_v16 = vadd.f32 %v716_v15, %v620_v2  ;;  %v910_v17 = vpop.f32.mrb[5].mxu1 }
 0x417   :  { %v727_v19 = vadd.f32 %v725_v18, %v720_v16 }
 0x419   :  { %947 = vtanh.f32 %v727_v19 }
 0x423   :  { %v948_v20 = vpop.eup %947 }
 0x424   :  { %733 = vrot.lane.b32.xlu0 %v948_v20, %s958_s18  ;;  %730 = vrot.lane.b32.xlu1 %v948_v20, %s957_s17 }
 0x496   :  { %v734_v21 = vpop.permute.xlu0 %733  ;;  %v731_v22 = vpop.permute.xlu1 %730 }
 0x497   :  { %v736_v23 = vsel %vm239_vm6, %v731_v22, %v734_v21 }
 0x498   :  { %v737_v24 = vmax.f32 %v948_v20, %v736_v23 }
 0x49a   :  { %916 = vmatmul.mubr.msk.f32.vlgmr.msra.gmra.mrb[8].mxu0 %vm738_vm2, %v737_v24 }
 0x56d   :  { %v808_v26 = vpop.f32.mrb[8].mxu0 }
 0x56e   :  { %v813_v28 = vmul.f32 %v812_v25, %v808_v26  ;;  %v917_v29 = vpop.f32.mrb[9].mxu0 }
 0x570   :  { %v815_v30 = vadd.f32 %v814_v27, %v813_v28 }
 0x572   :  { %817 = vst.msk [vmem:[%s1147_s9] sm:$0xff] %vm816_vm7, %v815_v30 }

</bundles_post_ra>
